<compile_context>
chip_gen: v7x
topology: tpu7x:2x2x1
jax: 0.10.0
libtpu: 0.0.40
codegen_flags: <defaults>
</compile_context>

<pallas_src>
import jax
import jax.numpy as jnp
from jax import lax
from jax.experimental import pallas as pl
from jax.experimental.pallas import tpu as pltpu


def _round_up(v, m):
    return ((v + m - 1) // m) * m


# ---------------------------------------------------------------------------
# Kernel: one batch tile per grid step — 3 MXU matmuls (bf16 in, f32 acc) with
# an f32 bias/ReLU epilogue and a transposed, low-writeback final store.
# ---------------------------------------------------------------------------
def _mlp_kernel(x_ref, w1_ref, b1_ref, w2_ref, b2_ref, w3_ref, b3_ref, o_ref):
    # x streamed as int8 (0/1 adjacency) -> widen to bf16 only (exact for 0/1).
    x = x_ref[...].astype(jnp.bfloat16)
    h1 = jnp.dot(x, w1_ref[...], preferred_element_type=jnp.float32) + b1_ref[...]
    h1 = jnp.maximum(h1, 0.0).astype(jnp.bfloat16)
    h2 = jnp.dot(h1, w2_ref[...], preferred_element_type=jnp.float32) + b2_ref[...]
    h2 = jnp.maximum(h2, 0.0).astype(jnp.bfloat16)
    # Final layer transposed: contract hidden (lhs dim 0 / rhs dim 1) so the
    # result is (out_rows, tb): 8 f32 sublanes x lane-dense batch writeback.
    out_t = lax.dot_general(
        w3_ref[...], h2,
        dimension_numbers=(((0,), (1,)), ((), ())),
        preferred_element_type=jnp.float32)
    o_ref[...] = out_t + b3_ref[...]


def _resident_spec(shape):
    # Constant block index -> fetched once, stays VMEM-resident across steps.
    idx = lambda i: (0,) * len(shape)
    try:
        # Single buffer for weights/biases (double-buffering them only doubles
        # their VMEM footprint; matters at production sizes on v7x's 64 MiB).
        return pl.BlockSpec(shape, idx, pipeline_mode=pl.Buffered(1))
    except TypeError:  # jax without pipeline_mode kwarg — fall back cleanly
        return pl.BlockSpec(shape, idx)


def _derive_batch_tile(batch, input_dim, h_pad, out_rows, x_itemsize, *,
                       target_stream_bytes, tile_vmem_budget, min_steps):
    # Streaming target: ~target_stream_bytes of x per buffer amortizes the
    # ~0.35 us per-grid-step overhead (tile *bytes*, not rows, decide this).
    tb_stream = max(1, target_stream_bytes // max(1, input_dim * x_itemsize))
    # VMEM cap per batch row: double-buffered x + out blocks plus the f32/bf16
    # hidden-activation temporaries.
    per_row = (2 * input_dim * x_itemsize      # x (double buffered)
               + 2 * out_rows * 4              # transposed f32 out (double buffered)
               + 2 * h_pad * 4                 # h1 + h2 f32
               + 2 * h_pad * 2)                # h1 + h2 bf16 MXU inputs
    tb_vmem = max(1, tile_vmem_budget // per_row)
    # Keep >= min_steps grid steps at large B so v7x's two TensorCores both
    # get work from the "parallel" batch axis (no-op on single-TC v5e/v6e).
    tb_steps = _round_up(max(1, pl.cdiv(batch, min_steps)), 128)
    tb = min(tb_stream, tb_vmem, tb_steps)
    # Multiple of 128: lane-dense output stores + covers int8(32)/bf16(16)
    # sublane packing of the streamed x tile.
    return max(128, (tb // 128) * 128)


def graph_statistics_forward(adj_tensor, params, *, assume_binary=True,
                             target_stream_bytes=4 << 20, min_steps=8):
    """adj_tensor: (B, N, N). Returns (B, output_dim) float32.

    assume_binary=True (default): entries must be 0/1 (bool/int/float); they
    are streamed as int8 exactly.  For weighted graphs pass
    assume_binary=False (streams bf16; lossy beyond 8 mantissa bits).
    """
    w1, b1, w2, b2, w3, b3 = params
    B, N, _ = adj_tensor.shape
    input_dim = N * N
    hidden_dim = w1.shape[1]
    output_dim = w3.shape[1]

    # --- host-side padding / dtype prep (zero padding -> exact) ------------
    h_pad = _round_up(hidden_dim, 128)
    out_rows = _round_up(output_dim, 8)
    hp = h_pad - hidden_dim

    w1p = jnp.pad(w1, ((0, 0), (0, hp))).astype(jnp.bfloat16)
    b1p = jnp.pad(b1, ((0, 0), (0, hp))).astype(jnp.float32)
    w2p = jnp.pad(w2, ((0, hp), (0, hp))).astype(jnp.bfloat16)
    b2p = jnp.pad(b2, ((0, 0), (0, hp))).astype(jnp.float32)
    w3p = jnp.pad(w3, ((0, hp), (0, out_rows - output_dim))).astype(jnp.bfloat16)
    b3p = jnp.pad(b3.reshape(-1, 1),
                  ((0, out_rows - output_dim), (0, 0))).astype(jnp.float32)

    # --- streamed x dtype ---------------------------------------------------
    if assume_binary or not jnp.issubdtype(adj_tensor.dtype, jnp.floating):
        x = adj_tensor.reshape(B, input_dim).astype(jnp.int8)      # exact for 0/1
    else:
        x = adj_tensor.reshape(B, input_dim).astype(jnp.bfloat16)  # weighted graphs
    x_itemsize = x.dtype.itemsize

    # --- VMEM budget / batch tile -------------------------------------------
    try:
        phys_vmem = pltpu.get_tpu_info().vmem_capacity_bytes
    except Exception:
        phys_vmem = 64 << 20                       # v7x physical; safe everywhere
    vmem_limit = int(phys_vmem * 3 // 4)           # ~96 MiB v5e/v6e, ~48 MiB v7x

    weight_bytes = ((w1p.size + w2p.size + w3p.size) * 2
                    + (b1p.size + b2p.size + b3p.size) * 4)
    tile_vmem_budget = max(2 << 20, vmem_limit // 2 - weight_bytes)

    tb = _derive_batch_tile(B, input_dim, h_pad, out_rows, x_itemsize,
                            target_stream_bytes=target_stream_bytes,
                            tile_vmem_budget=tile_vmem_budget,
                            min_steps=min_steps)
    b_pad = _round_up(B, tb)
    if b_pad != B:
        x = jnp.pad(x, ((0, b_pad - B), (0, 0)))

    grid = (b_pad // tb,)

    x_spec = pl.BlockSpec((tb, input_dim), lambda i: (i, 0))
    out_spec = pl.BlockSpec((out_rows, tb), lambda i: (0, i))

    # Advisory cost model (uses real padded dims / streamed dtypes).
    flops = 2 * b_pad * (input_dim * h_pad + h_pad * h_pad + h_pad * out_rows)
    bytes_accessed = (b_pad * input_dim * x_itemsize
                      + out_rows * b_pad * 4
                      + weight_bytes)

    out_t = pl.pallas_call(
        _mlp_kernel,
        out_shape=jax.ShapeDtypeStruct((out_rows, b_pad), jnp.float32),
        grid=grid,
        in_specs=[
            x_spec,
            _resident_spec(w1p.shape), _resident_spec(b1p.shape),
            _resident_spec(w2p.shape), _resident_spec(b2p.shape),
            _resident_spec(w3p.shape), _resident_spec(b3p.shape),
        ],
        out_specs=out_spec,
        compiler_params=pltpu.CompilerParams(
            dimension_semantics=("parallel",),     # megacore sharding on v7x
            vmem_limit_bytes=vmem_limit,
        ),
        cost_estimate=pl.CostEstimate(
            flops=flops, transcendentals=0, bytes_accessed=bytes_accessed),
    )(x, w1p, b1p, w2p, b2p, w3p, b3p)

    # (out_rows, b_pad) -> (B, output_dim); tiny (7, B) transpose in the wrapper.
    return out_t[:output_dim, :B].T


def init_params(key, input_dim, hidden_dim, output_dim=7):
    """PyTorch-style uniform(+/- 1/sqrt(fan_in)) init; weights stored (in, out)."""
    ks = jax.random.split(key, 6)

    def lin(kw, kb, fan_in, fan_out):
        bound = 1.0 / jnp.sqrt(fan_in)
        w = jax.random.uniform(kw, (fan_in, fan_out), jnp.float32, -bound, bound)
        b = jax.random.uniform(kb, (1, fan_out), jnp.float32, -bound, bound)
        return w, b

    w1, b1 = lin(ks[0], ks[1], input_dim, hidden_dim)
    w2, b2 = lin(ks[2], ks[3], hidden_dim, hidden_dim)
    w3, b3 = lin(ks[4], ks[5], hidden_dim, output_dim)
    return (w1, b1, w2, b2, w3, b3)


def _reference_forward_f32(adj_tensor, params):
    w1, b1, w2, b2, w3, b3 = params
    B = adj_tensor.shape[0]
    x = adj_tensor.reshape(B, -1)
    h1 = jnp.maximum(x @ w1 + b1, 0.0)
    h2 = jnp.maximum(h1 @ w2 + b2, 0.0)
    return h2 @ w3 + b3


def _reference_forward_matched(adj_tensor, params):
    # Mirrors the kernel's precision choices (bf16 weights/activations, f32
    # accumulation) for a tight numerical cross-check.
    w1, b1, w2, b2, w3, b3 = params
    B = adj_tensor.shape[0]
    x = adj_tensor.reshape(B, -1).astype(jnp.int8).astype(jnp.bfloat16)
    h1 = jnp.dot(x, w1.astype(jnp.bfloat16),
                 preferred_element_type=jnp.float32) + b1
    h1 = jnp.maximum(h1, 0.0).astype(jnp.bfloat16)
    h2 = jnp.dot(h1, w2.astype(jnp.bfloat16),
                 preferred_element_type=jnp.float32) + b2
    h2 = jnp.maximum(h2, 0.0).astype(jnp.bfloat16)
    return jnp.dot(h2, w3.astype(jnp.bfloat16),
                   preferred_element_type=jnp.float32) + b3


if __name__ == "__main__":
    key = jax.random.PRNGKey(0)
    k_adj, k_params = jax.random.split(key)

    batch = 2
    num_nodes = 8                 # adjacency (B, N, N) -> input_dim = N*N = 64
    hidden_dim = 32
    output_dim = 7
    input_dim = num_nodes * num_nodes

    # Binary adjacency (0/1) — exact in the int8 streaming path.
    adj = (jax.random.uniform(k_adj, (batch, num_nodes, num_nodes)) > 0.5).astype(
        jnp.float32
    )

    params = init_params(k_params, input_dim, hidden_dim, output_dim)

    out = graph_statistics_forward(adj, params)
    out = jax.block_until_ready(out)
    assert out.shape == (batch, output_dim)

    # Tight check against a precision-matched (bf16-weight/activation) reference.
    ref_matched = _reference_forward_matched(adj, params)
    assert jnp.allclose(out, ref_matched, atol=5e-3, rtol=5e-3)

    # Loose sanity check against the full-f32 PyTorch-equivalent reference
    # (kernel uses bf16 MXU inputs, so exact 1e-5 agreement is not expected).
    ref_f32 = _reference_forward_f32(adj, params)
    assert jnp.allclose(out, ref_f32, atol=5e-2, rtol=5e-2)

    print("KERNEL_OK")
</pallas_src>

<mosaic_0001>
module attributes {stable_mosaic.version = 11 : i64} {
  func.func @_mlp_kernel(%arg0: i32, %arg1: memref<128x64xi8, #tpu.memory_space<vmem>>, %arg2: memref<64x128xbf16, #tpu.memory_space<vmem>>, %arg3: memref<1x128xf32, #tpu.memory_space<vmem>>, %arg4: memref<128x128xbf16, #tpu.memory_space<vmem>>, %arg5: memref<1x128xf32, #tpu.memory_space<vmem>>, %arg6: memref<128x8xbf16, #tpu.memory_space<vmem>>, %arg7: memref<8x1xf32, #tpu.memory_space<vmem>>, %arg8: memref<8x128xf32, #tpu.memory_space<vmem>>) attributes {dimension_semantics = [#tpu.dimension_semantics<parallel>], iteration_bounds = array<i64: 1>, scalar_prefetch = 0 : i64, scratch_operands = 0 : i64, tpu.core_type = #tpu.core_type<tc>, window_params = [{transform_indices = @transform_0, window_bounds = array<i64: 128, 64>}, {pipeline_mode = #tpu.pipeline_mode<synchronous>, transform_indices = @transform_1, window_bounds = array<i64: 64, 128>}, {pipeline_mode = #tpu.pipeline_mode<synchronous>, transform_indices = @transform_2, window_bounds = array<i64: 1, 128>}, {pipeline_mode = #tpu.pipeline_mode<synchronous>, transform_indices = @transform_3, window_bounds = array<i64: 128, 128>}, {pipeline_mode = #tpu.pipeline_mode<synchronous>, transform_indices = @transform_4, window_bounds = array<i64: 1, 128>}, {pipeline_mode = #tpu.pipeline_mode<synchronous>, transform_indices = @transform_5, window_bounds = array<i64: 128, 8>}, {pipeline_mode = #tpu.pipeline_mode<synchronous>, transform_indices = @transform_6, window_bounds = array<i64: 8, 1>}, {transform_indices = @transform_7, window_bounds = array<i64: 8, 128>}]} {
    %c0 = arith.constant 0 : index
    %c0_0 = arith.constant 0 : index
    %0 = vector.load %arg1[%c0, %c0_0] : memref<128x64xi8, #tpu.memory_space<vmem>>, vector<128x64xi8>
    %1 = arith.sitofp %0 : vector<128x64xi8> to vector<128x64xbf16>
    %c0_1 = arith.constant 0 : index
    %c0_2 = arith.constant 0 : index
    %2 = vector.load %arg2[%c0_1, %c0_2] : memref<64x128xbf16, #tpu.memory_space<vmem>>, vector<64x128xbf16>
    %cst = arith.constant dense<0.000000e+00> : vector<128x128xf32>
    %3 = tpu.matmul %1, %2, %cst {dimension_numbers = #tpu.dot_dimension_numbers<[1], [0], [0], [1], [0, 0, 1, 1], [], []>} : vector<128x64xbf16>, vector<64x128xbf16>, vector<128x128xf32> -> vector<128x128xf32>
    %c0_3 = arith.constant 0 : index
    %c0_4 = arith.constant 0 : index
    %4 = vector.load %arg3[%c0_3, %c0_4] : memref<1x128xf32, #tpu.memory_space<vmem>>, vector<1x128xf32>
    %5 = vector.broadcast %4 : vector<1x128xf32> to vector<128x128xf32>
    %6 = arith.addf %3, %5 : vector<128x128xf32>
    %cst_5 = arith.constant 0.000000e+00 : f32
    %7 = vector.broadcast %cst_5 : f32 to vector<128x128xf32>
    %8 = arith.maximumf %6, %7 : vector<128x128xf32>
    %9 = arith.truncf %8 : vector<128x128xf32> to vector<128x128xbf16>
    %c0_6 = arith.constant 0 : index
    %c0_7 = arith.constant 0 : index
    %10 = vector.load %arg4[%c0_6, %c0_7] : memref<128x128xbf16, #tpu.memory_space<vmem>>, vector<128x128xbf16>
    %cst_8 = arith.constant dense<0.000000e+00> : vector<128x128xf32>
    %11 = tpu.matmul %9, %10, %cst_8 {dimension_numbers = #tpu.dot_dimension_numbers<[1], [0], [0], [1], [0, 0, 1, 1], [], []>} : vector<128x128xbf16>, vector<128x128xbf16>, vector<128x128xf32> -> vector<128x128xf32>
    %c0_9 = arith.constant 0 : index
    %c0_10 = arith.constant 0 : index
    %12 = vector.load %arg5[%c0_9, %c0_10] : memref<1x128xf32, #tpu.memory_space<vmem>>, vector<1x128xf32>
    %13 = vector.broadcast %12 : vector<1x128xf32> to vector<128x128xf32>
    %14 = arith.addf %11, %13 : vector<128x128xf32>
    %cst_11 = arith.constant 0.000000e+00 : f32
    %15 = vector.broadcast %cst_11 : f32 to vector<128x128xf32>
    %16 = arith.maximumf %14, %15 : vector<128x128xf32>
    %17 = arith.truncf %16 : vector<128x128xf32> to vector<128x128xbf16>
    %c0_12 = arith.constant 0 : index
    %c0_13 = arith.constant 0 : index
    %18 = vector.load %arg6[%c0_12, %c0_13] : memref<128x8xbf16, #tpu.memory_space<vmem>>, vector<128x8xbf16>
    %cst_14 = arith.constant dense<0.000000e+00> : vector<8x128xf32>
    %19 = tpu.matmul %18, %17, %cst_14 {dimension_numbers = #tpu.dot_dimension_numbers<[0], [1], [1], [0], [0, 1, 1, 0], [], []>} : vector<128x8xbf16>, vector<128x128xbf16>, vector<8x128xf32> -> vector<8x128xf32>
    %c0_15 = arith.constant 0 : index
    %c0_16 = arith.constant 0 : index
    %20 = vector.load %arg7[%c0_15, %c0_16] : memref<8x1xf32, #tpu.memory_space<vmem>>, vector<8x1xf32>
    %21 = vector.broadcast %20 : vector<8x1xf32> to vector<8x128xf32>
    %22 = arith.addf %19, %21 : vector<8x128xf32>
    %c0_17 = arith.constant 0 : index
    %c0_18 = arith.constant 0 : index
    %23 = vector.load %arg8[%c0_17, %c0_18] : memref<8x128xf32, #tpu.memory_space<vmem>>, vector<8x128xf32>
    tpu.vector_store %arg8[%c0_17, %c0_18], %22 {strides = array<i32>} : memref<8x128xf32, #tpu.memory_space<vmem>>, vector<8x128xf32>,
    return
  }
  func.func @transform_0(%arg0: i32) -> (i32, i32) {
    %c0_i32 = arith.constant 0 : i32
    %c0_i32_0 = arith.constant 0 : i32
    return %arg0, %c0_i32 : i32, i32
  }
  func.func @transform_1(%arg0: i32) -> (i32, i32) {
    %c0_i32 = arith.constant 0 : i32
    %c0_i32_0 = arith.constant 0 : i32
    %c0_i32_1 = arith.constant 0 : i32
    return %c0_i32, %c0_i32_0 : i32, i32
  }
  func.func @transform_2(%arg0: i32) -> (i32, i32) {
    %c0_i32 = arith.constant 0 : i32
    %c0_i32_0 = arith.constant 0 : i32
    %c0_i32_1 = arith.constant 0 : i32
    return %c0_i32, %c0_i32_0 : i32, i32
  }
  func.func @transform_3(%arg0: i32) -> (i32, i32) {
    %c0_i32 = arith.constant 0 : i32
    %c0_i32_0 = arith.constant 0 : i32
    %c0_i32_1 = arith.constant 0 : i32
    return %c0_i32, %c0_i32_0 : i32, i32
  }
  func.func @transform_4(%arg0: i32) -> (i32, i32) {
    %c0_i32 = arith.constant 0 : i32
    %c0_i32_0 = arith.constant 0 : i32
    %c0_i32_1 = arith.constant 0 : i32
    return %c0_i32, %c0_i32_0 : i32, i32
  }
  func.func @transform_5(%arg0: i32) -> (i32, i32) {
    %c0_i32 = arith.constant 0 : i32
    %c0_i32_0 = arith.constant 0 : i32
    %c0_i32_1 = arith.constant 0 : i32
    return %c0_i32, %c0_i32_0 : i32, i32
  }
  func.func @transform_6(%arg0: i32) -> (i32, i32) {
    %c0_i32 = arith.constant 0 : i32
    %c0_i32_0 = arith.constant 0 : i32
    %c0_i32_1 = arith.constant 0 : i32
    return %c0_i32, %c0_i32_0 : i32, i32
  }
  func.func @transform_7(%arg0: i32) -> (i32, i32) {
    %c0_i32 = arith.constant 0 : i32
    %c0_i32_0 = arith.constant 0 : i32
    return %c0_i32, %arg0 : i32, i32
  }
}

</mosaic_0001>

<bundles_post_ra>
// kernel: tpu_custom_call.1
= control target key start
LH: loop header
LB: loop body
LE: loop exit
PB: predicated region body
PF: predicated region fallthrough
CT: control target
= control target key end

     0   :  { %vm79_vm0 = vcmask 523264   ;;  %s905_s0 = inlined_call_operand.vmem [shape: s8[128,64], index: 0, kind: input, shape index: {}]   ;;  %s906_s1 = inlined_call_operand.vmem [shape: bf16[64,128], index: 1, kind: input, shape index: {}]   ;;  %s907_s2 = inlined_call_operand.vmem [shape: f32[1,128], index: 2, kind: input, shape index: {}]   ;;  %s908_s3 = inlined_call_operand.vmem [shape: bf16[128,128], index: 3, kind: input, shape index: {}]   ;;  %s909_s4 = inlined_call_operand.vmem [shape: f32[1,128], index: 4, kind: input, shape index: {}]   ;;  %s910_s5 = inlined_call_operand.vmem [shape: bf16[128,8], index: 5, kind: input, shape index: {}]   ;;  %s911_s6 = inlined_call_operand.vmem [shape: f32[8,1], index: 6, kind: input, shape index: {}]   ;;  %s912_s7 = inlined_call_operand.hbm [shape: f32[8,128], index: 7, kind: output, shape index: {}]  }
   0x1   :  { %v707_v0 = vld [vmem:[%s906_s1] sm:$0xff]   ;;  %v708_v1 = vld [vmem:[%s906_s1 + $0x8] sm:$0xff]   ;;  %v709_v2 = vld [vmem:[%s906_s1 + $0x10] sm:$0xff]  }
   0x2   :  { %625 = vmatprep.subr.bf16.mxu1 %v707_v0  ;;  %v28_v3 = vld [vmem:[%s905_s0] sm:$0xff]  ;;  %v710_v5 = vld [vmem:[%s906_s1 + $0x18] sm:$0xff]   ;;  %v29_v6 = vld [vmem:[%s905_s0 + $0x8] sm:$0xff] }
   0x3   :  { %626 = vmatpush3.bf16.msra.mxu1 %v707_v0  ;;  %v32_v4 = vunpack.c.l.s8.bf16 %v28_v3  ;;  %v711_v7 = vld [vmem:[%s908_s3] sm:$0xff]   ;;  %v33_v8 = vunpack.c.h.s8.bf16 %v28_v3  ;;  %v712_v9 = vld [vmem:[%s908_s3 + $0x8] sm:$0xff]   ;;  %v34_v10 = vunpack.c.l.s8.bf16 %v29_v6 }
   0x4   :  { %627 = vmatprep.subr.bf16.mxu1 %v708_v1 }
   0x5   :  { %633 = vmatprep.mubr.msk.bf16.mxu1 %vm79_vm0, %v32_v4 }
   0x7   :  { %628 = vmatpush3.bf16.msra.mxu1 %v708_v1 }
   0x8   :  { %629 = vmatprep.subr.bf16.mxu1 %v709_v2 }
   0xb   :  { %630 = vmatpush3.bf16.msra.mxu1 %v709_v2 }
   0xc   :  { %631 = vmatprep.subr.bf16.mxu1 %v710_v5 }
   0xf   :  { %632 = vmatpush3.bf16.msra.mxu1 %v710_v5 }
  0x10   :  { %649 = vmatprep.subr.bf16.mxu1 %v711_v7 }
  0x12   :  { %634 = vmatmul.mubr.msk.bf16.vlgmr.msra.gmra.mrb[0].mxu1 %vm79_vm0, %v33_v8 }
  0x13   :  { %12 = vsyncpa [#allocation3], 0  ;;  %637 = vmatprep.mubr.msk.bf16.mxu1 %vm79_vm0, %v34_v10  ;;  %650 = vmatpush3.bf16.msra.mxu1 %v711_v7  ;;  %v30_v11 = vld [vmem:[%s905_s0 + $0x10] sm:$0xff]  ;;  %v35_v13 = vunpack.c.h.s8.bf16 %v29_v6  ;;  %v714_v15 = vld [vmem:[%s908_s3 + $0x18] sm:$0xff]   ;;  %vm752_vm1 = vmmov 0  }
  0x14   :  { %651 = vmatprep.subr.bf16.mxu1 %v712_v9  ;;  %v713_v12 = vld [vmem:[%s908_s3 + $0x10] sm:$0xff]   ;;  %v36_v14 = vunpack.c.l.s8.bf16 %v30_v11  ;;  %v31_v16 = vld [vmem:[%s905_s0 + $0x18] sm:$0xff]  ;;  %v715_v17 = vld [vmem:[%s908_s3 + $0x20] sm:$0xff]   ;;  %v37_v18 = vunpack.c.h.s8.bf16 %v30_v11 }
  0x15   :  { %v38_v19 = vunpack.c.l.s8.bf16 %v31_v16  ;;  %v716_v20 = vld [vmem:[%s908_s3 + $0x28] sm:$0xff]   ;;  %v39_v21 = vunpack.c.h.s8.bf16 %v31_v16  ;;  %v717_v22 = vld [vmem:[%s908_s3 + $0x30] sm:$0xff]   ;;  %v718_v23 = vld [vmem:[%s908_s3 + $0x38] sm:$0xff]  }
  0x16   :  { %v719_v24 = vld [vmem:[%s910_s5] sm:$0xff]   ;;  %v720_v25 = vld [vmem:[%s910_s5 + $0x8] sm:$0xff]   ;;  %v721_v26 = vld [vmem:[%s910_s5 + $0x10] sm:$0xff]  }
  0x17   :  { %652 = vmatpush3.bf16.msra.mxu1 %v712_v9  ;;  %487 = vxpose.xlu0.c.b16.start [1/8] (narrow) %v719_v24, 16  ;;  %v722_v27 = vld [vmem:[%s910_s5 + $0x18] sm:$0xff]   ;;  %v723_v28 = vld [vmem:[%s910_s5 + $0x20] sm:$0xff]   ;;  %v724_v29 = vld [vmem:[%s910_s5 + $0x28] sm:$0xff]  }
  0x18   :  { %653 = vmatprep.subr.bf16.mxu1 %v713_v12  ;;  %v725_v30 = vld [vmem:[%s910_s5 + $0x30] sm:$0xff]   ;;  %v726_v31 = vld [vmem:[%s910_s5 + $0x38] sm:$0xff]   ;;  %v558_v32 = vld [vmem:[%s907_s2] ss:$0 sm:$0xff] }
  0x1a   :  { %638 = vmatmul.mubr.msk.bf16.gmra.mrb[4].mxu1 %vm79_vm0, %v35_v13 }
  0x1b   :  { %641 = vmatprep.mubr.msk.bf16.mxu1 %vm79_vm0, %v36_v14  ;;  %654 = vmatpush3.bf16.msra.mxu1 %v713_v12 }
  0x1c   :  { %655 = vmatprep.subr.bf16.mxu1 %v714_v15  ;;  %488 = vxpose.xlu0.c.b16.cont [2/8] (narrow) %v720_v25, 16  ;;  %v751_v25 = vmov 0.0  }
  0x1d   :  { %681 = vmatprep.subr.bf16.mxu0 %v751_v25  ;;  %697 = vmatprep.mubr.msk.bf16.mxu0 %vm752_vm1, %v751_v25 }
  0x1f   :  { %656 = vmatpush3.bf16.msra.mxu1 %v714_v15 }
  0x20   :  { %657 = vmatprep.subr.bf16.mxu1 %v715_v17  ;;  %489 = vxpose.xlu0.c.b16.cont [3/8] (narrow) %v721_v26, 16  ;;  %v433_v26 = vld [vmem:[%s911_s6] sm:$0xff] }
  0x22   :  { %642 = vmatmul.mubr.msk.bf16.gmra.mrb[8].mxu1 %vm79_vm0, %v37_v18 }
  0x23   :  { %645 = vmatprep.mubr.msk.bf16.mxu1 %vm79_vm0, %v38_v19  ;;  %658 = vmatpush3.bf16.msra.mxu1 %v715_v17 }
  0x24   :  { %659 = vmatprep.subr.bf16.mxu1 %v716_v20  ;;  %490 = vxpose.xlu0.c.b16.cont [4/8] (narrow) %v722_v27, 16  ;;  %v753_v27 = vmov 0  }
  0x25   :  { %705 = vset.pattern.permute.xlu1 %v753_v27 }
  0x26   :  { %436 = vperm.xlu1 %705, %v433_v26  }
  0x27   :  { %660 = vmatpush3.bf16.msra.mxu1 %v716_v20 }
  0x28   :  { %661 = vmatprep.subr.bf16.mxu1 %v717_v22  ;;  %491 = vxpose.xlu0.c.b16.cont [5/8] (narrow) %v723_v28, 16  ;;  %v571_v28 = vld [vmem:[%s909_s4] ss:$0 sm:$0xff]  ;;  %s754_s4 = smov [#allocation2]  }
  0x29   :  { %s550_s6 = sshll.u32 %s754_s4, 4  ;;  %s551_s6 = int_to_ptr.vmem [resolvable:$true] %s550_s6 }
  0x2a   :  { %646 = vmatmul.mubr.msk.bf16.gmra.mrb[12].mxu1 %vm79_vm0, %v39_v21  ;;  %s727_s26 = scalar_lea.vmem %s551_s6, 128  ;;  %p732_p1 = scmp.lt.s32.totalorder %s551_s6, %s551_s6 }
  0x2b   :  { %662 = vmatpush3.bf16.msra.mxu1 %v717_v22  ;;  %p728_p0 = scmp.ne.s32.totalorder %s551_s6, %s727_s26  ;;  %p733_p2 = scmp.lt.s32.totalorder %s727_s26, %s727_s26 }
  0x2c   :  { %663 = vmatprep.subr.bf16.mxu1 %v718_v23  ;;  %492 = vxpose.xlu0.c.b16.cont [6/8] (narrow) %v724_v29, 16 }
  0x2d   :  { %p734_p3 = por %p733_p2, %p732_p1 }
  0x2f   :  { %664 = vmatpush3.bf16.msra.mxu1 %v718_v23  ;;  %p735_p4 = pnand %p734_p3, %p728_p0 }
  0x30   :  { %493 = vxpose.xlu0.c.b16.cont [7/8] (narrow) %v725_v30, 16 }
  0x34   :  { %494 = vxpose.xlu0.c.b16.end [8/8] (narrow) %v726_v31, 16 }
  0x3d   :  { %706 = vset.pattern.permute.xlu0 %v753_v27 }
  0xe5   :  { %v635_v33 = vpop.f32.mrb[0].mxu1 }
  0xe6   :  { %v147_v34 = vadd.f32 %v635_v33, %v558_v32  ;;  %v138_v35 = vpop.f32.mrb[1].mxu1 }
  0xe7   :  { %v139_v36 = vadd.f32 %v558_v32, %v138_v35  ;;  %v636_v37 = vpop.f32.mrb[2].mxu1 }
  0xe8   :  { %v150_v38 = vadd.f32 %v636_v37, %v558_v32  ;;  %v141_v39 = vpop.f32.mrb[3].mxu1  ;;  %v203_v41 = vmax.f32 %v147_v34, 0.0 }
  0xe9   :  { %v142_v40 = vadd.f32 %v558_v32, %v141_v39  ;;  %v201_v43 = vmax.f32 %v139_v36, 0.0 }
  0xea   :  { %v204_v42 = vmax.f32 %v150_v38, 0.0 }
  0xeb   :  { %v202_v44 = vmax.f32 %v142_v40, 0.0 }
  0xec   :  { %v218_v45 = vpack.c.bf16 %v204_v42, %v203_v41 }
  0xed   :  { %v217_v46 = vpack.c.bf16 %v202_v44, %v201_v43  ;;  %v639_v47 = vpop.f32.mrb[4].mxu1 }
  0xee   :  { %v163_v48 = vadd.f32 %v639_v47, %v558_v32  ;;  %v154_v49 = vpop.f32.mrb[5].mxu1 }
  0xef   :  { %v155_v50 = vadd.f32 %v558_v32, %v154_v49  ;;  %665 = vmatprep.mubr.bf16.mxu1 %v217_v46  ;;  %v640_v51 = vpop.f32.mrb[6].mxu1 }
  0xf0   :  { %v207_v52 = vmax.f32 %v163_v48, 0.0  ;;  %v166_v53 = vadd.f32 %v640_v51, %v558_v32  ;;  %666 = vmatmul.mubr.bf16.vlgmr.msra.gmra.mrb[16].mxu1 %v218_v45  ;;  %v157_v54 = vpop.f32.mrb[7].mxu1 }
  0xf1   :  { %v205_v55 = vmax.f32 %v155_v50, 0.0  ;;  %v158_v56 = vadd.f32 %v558_v32, %v157_v54 }
  0xf2   :  { %v208_v57 = vmax.f32 %v166_v53, 0.0 }
  0xf3   :  { %v206_v58 = vmax.f32 %v158_v56, 0.0 }
  0xf4   :  { %v220_v59 = vpack.c.bf16 %v208_v57, %v207_v52 }
  0xf5   :  { %v219_v60 = vpack.c.bf16 %v206_v58, %v205_v55  ;;  %v643_v61 = vpop.f32.mrb[8].mxu1 }
  0xf6   :  { %v179_v62 = vadd.f32 %v643_v61, %v558_v32  ;;  %v170_v63 = vpop.f32.mrb[9].mxu1 }
  0xf7   :  { %669 = vmatprep.mubr.bf16.mxu1 %v219_v60  ;;  %v171_v0 = vadd.f32 %v558_v32, %v170_v63  ;;  %v644_v1 = vpop.f32.mrb[10].mxu1 }
  0xf8   :  { %670 = vmatmul.mubr.bf16.gmra.mrb[20].mxu1 %v220_v59  ;;  %v211_v2 = vmax.f32 %v179_v62, 0.0  ;;  %v182_v3 = vadd.f32 %v644_v1, %v558_v32  ;;  %v173_v4 = vpop.f32.mrb[11].mxu1 }
  0xf9   :  { %v209_v5 = vmax.f32 %v171_v0, 0.0  ;;  %v174_v6 = vadd.f32 %v558_v32, %v173_v4 }
  0xfa   :  { %v212_v7 = vmax.f32 %v182_v3, 0.0 }
  0xfb   :  { %v210_v8 = vmax.f32 %v174_v6, 0.0 }
  0xfc   :  { %v222_v9 = vpack.c.bf16 %v212_v7, %v211_v2 }
  0xfd   :  { %v221_v10 = vpack.c.bf16 %v210_v8, %v209_v5  ;;  %v647_v11 = vpop.f32.mrb[12].mxu1 }
  0xfe   :  { %v195_v12 = vadd.f32 %v647_v11, %v558_v32  ;;  %v186_v13 = vpop.f32.mrb[13].mxu1 }
  0xff   :  { %673 = vmatprep.mubr.bf16.mxu1 %v221_v10  ;;  %v187_v14 = vadd.f32 %v558_v32, %v186_v13  ;;  %v648_v15 = vpop.f32.mrb[14].mxu1 }
 0x100   :  { %674 = vmatmul.mubr.bf16.gmra.mrb[24].mxu1 %v222_v9  ;;  %v215_v16 = vmax.f32 %v195_v12, 0.0  ;;  %v198_v17 = vadd.f32 %v648_v15, %v558_v32  ;;  %v189_v18 = vpop.f32.mrb[15].mxu1 }
 0x101   :  { %v213_v19 = vmax.f32 %v187_v14, 0.0  ;;  %v190_v20 = vadd.f32 %v558_v32, %v189_v18 }
 0x102   :  { %v216_v21 = vmax.f32 %v198_v17, 0.0 }
 0x103   :  { %v214_v22 = vmax.f32 %v190_v20, 0.0 }
 0x104   :  { %v224_v23 = vpack.c.bf16 %v216_v21, %v215_v16  ;;  %v495_v21 = vpop.trf.xlu0 }
 0x105   :  { %v223_v24 = vpack.c.bf16 %v214_v22, %v213_v19  ;;  %v437_v22 = vpop.permute.xlu1 %436 }
 0x107   :  { %677 = vmatprep.mubr.bf16.mxu1 %v223_v24 }
 0x108   :  { %678 = vmatmul.mubr.bf16.gmra.mrb[28].mxu1 %v224_v23 }
 0x1c3   :  { %v667_v29 = vpop.f32.mrb[16].mxu1 }
 0x1c4   :  { %v339_v30 = vadd.f32 %v667_v29, %v571_v28  ;;  %v330_v31 = vpop.f32.mrb[17].mxu1 }
 0x1c5   :  { %v331_v32 = vadd.f32 %v571_v28, %v330_v31  ;;  %v668_v33 = vpop.f32.mrb[18].mxu1 }
 0x1c6   :  { %v342_v34 = vadd.f32 %v668_v33, %v571_v28  ;;  %v333_v35 = vpop.f32.mrb[19].mxu1  ;;  %v395_v37 = vmax.f32 %v339_v30, 0.0 }
 0x1c7   :  { %v334_v36 = vadd.f32 %v571_v28, %v333_v35  ;;  %v393_v39 = vmax.f32 %v331_v32, 0.0 }
 0x1c8   :  { %v396_v38 = vmax.f32 %v342_v34, 0.0 }
 0x1c9   :  { %v394_v40 = vmax.f32 %v334_v36, 0.0 }
 0x1ca   :  { %v410_v41 = vpack.c.bf16 %v396_v38, %v395_v37 }
 0x1cb   :  { %v671_v42 = vpop.f32.mrb[20].mxu1  ;;  %v409_v43 = vpack.c.bf16 %v394_v40, %v393_v39 }
 0x1cc   :  { %v355_v44 = vadd.f32 %v671_v42, %v571_v28  ;;  %v346_v45 = vpop.f32.mrb[21].mxu1 }
 0x1cd   :  { %v347_v46 = vadd.f32 %v571_v28, %v346_v45  ;;  %682 = vmatpush3.bf16.xpose.msra.mxu0 %v409_v43  ;;  %v672_v47 = vpop.f32.mrb[22].mxu1 }
 0x1ce   :  { %v399_v48 = vmax.f32 %v355_v44, 0.0  ;;  %v358_v49 = vadd.f32 %v672_v47, %v571_v28  ;;  %v349_v50 = vpop.f32.mrb[23].mxu1  ;;  %683 = vmatprep.subr.bf16.mxu0 %v751_v25 }
 0x1cf   :  { %v397_v51 = vmax.f32 %v347_v46, 0.0  ;;  %v350_v52 = vadd.f32 %v571_v28, %v349_v50 }
 0x1d0   :  { %v400_v53 = vmax.f32 %v358_v49, 0.0 }
 0x1d1   :  { %v398_v54 = vmax.f32 %v350_v52, 0.0 }
 0x1d2   :  { %v412_v55 = vpack.c.bf16 %v400_v53, %v399_v48 }
 0x1d3   :  { %v411_v56 = vpack.c.bf16 %v398_v54, %v397_v51  ;;  %v675_v57 = vpop.f32.mrb[24].mxu1 }
 0x1d4   :  { %v371_v58 = vadd.f32 %v675_v57, %v571_v28  ;;  %v362_v59 = vpop.f32.mrb[25].mxu1 }
 0x1d5   :  { %684 = vmatpush3.bf16.xpose.msra.mxu0 %v410_v41  ;;  %v363_v60 = vadd.f32 %v571_v28, %v362_v59  ;;  %v676_v61 = vpop.f32.mrb[26].mxu1 }
 0x1d6   :  { %v403_v62 = vmax.f32 %v371_v58, 0.0  ;;  %685 = vmatprep.subr.bf16.mxu0 %v751_v25  ;;  %v374_v63 = vadd.f32 %v676_v61, %v571_v28  ;;  %v365_v0 = vpop.f32.mrb[27].mxu1 }
 0x1d7   :  { %v401_v1 = vmax.f32 %v363_v60, 0.0  ;;  %v366_v2 = vadd.f32 %v571_v28, %v365_v0 }
 0x1d8   :  { %v404_v3 = vmax.f32 %v374_v63, 0.0 }
 0x1d9   :  { %v402_v4 = vmax.f32 %v366_v2, 0.0 }
 0x1da   :  { %v414_v5 = vpack.c.bf16 %v404_v3, %v403_v62 }
 0x1db   :  { %v413_v6 = vpack.c.bf16 %v402_v4, %v401_v1  ;;  %v679_v7 = vpop.f32.mrb[28].mxu1 }
 0x1dc   :  { %v387_v8 = vadd.f32 %v679_v7, %v571_v28  ;;  %v378_v9 = vpop.f32.mrb[29].mxu1 }
 0x1dd   :  { %686 = vmatpush3.bf16.xpose.msra.mxu0 %v411_v56  ;;  %v379_v10 = vadd.f32 %v571_v28, %v378_v9  ;;  %v680_v11 = vpop.f32.mrb[30].mxu1 }
 0x1de   :  { %687 = vmatprep.subr.bf16.mxu0 %v751_v25  ;;  %v407_v12 = vmax.f32 %v387_v8, 0.0  ;;  %v390_v13 = vadd.f32 %v680_v11, %v571_v28  ;;  %v381_v14 = vpop.f32.mrb[31].mxu1 }
 0x1df   :  { %v405_v15 = vmax.f32 %v379_v10, 0.0  ;;  %v382_v16 = vadd.f32 %v571_v28, %v381_v14 }
 0x1e0   :  { %v408_v17 = vmax.f32 %v390_v13, 0.0 }
 0x1e1   :  { %v406_v18 = vmax.f32 %v382_v16, 0.0 }
 0x1e2   :  { %v416_v19 = vpack.c.bf16 %v408_v17, %v407_v12 }
 0x1e3   :  { %v415_v20 = vpack.c.bf16 %v406_v18, %v405_v15 }
 0x1e5   :  { %688 = vmatpush3.bf16.xpose.msra.mxu0 %v412_v55 }
 0x1e6   :  { %689 = vmatprep.subr.bf16.mxu0 %v751_v25 }
 0x1ed   :  { %690 = vmatpush3.bf16.xpose.msra.mxu0 %v413_v6 }
 0x1ee   :  { %691 = vmatprep.subr.bf16.mxu0 %v751_v25 }
 0x1f5   :  { %692 = vmatpush3.bf16.xpose.msra.mxu0 %v414_v5 }
 0x1f6   :  { %693 = vmatprep.subr.bf16.mxu0 %v751_v25 }
 0x1fd   :  { %694 = vmatpush3.bf16.xpose.msra.mxu0 %v415_v20 }
 0x1fe   :  { %695 = vmatprep.subr.bf16.mxu0 %v751_v25 }
 0x205   :  { %696 = vmatpush3.bf16.xpose.msra.mxu0 %v416_v19 }
 0x20c   :  { %698 = vmatmul.mubr.bf16.vlgmr.msra.gmra.mrb[0].mxu0 %v495_v21 }
 0x2df   :  { %v537_v23 = vpop.f32.mrb[0].mxu0 }
 0x2e0   :  { %v538_v24 = vadd.f32 %v537_v23, %v437_v22  ;;  %v699_v26 = vpop.f32.mrb[1].mxu0 }
 0x2e1   :  { %v540_v27 = vpop.f32.mrb[2].mxu0 }
 0x2e2   :  { %543 = vst [vmem:[#allocation2] sm:$0xff] %v538_v24  ;;  %v700_v28 = vpop.f32.mrb[3].mxu0 }
 0x2e3   :  { %738 = shalt.err (!%p735_p4)
}
 0x2e4   :  { %s739_s28 = scalar_lea.hbm %s912_s7, 128 }
 0x2e5   :  { %p740_p5 = scmp.ne.s32.totalorder %s912_s7, %s739_s28  ;;  %p743_p6 = scmp.lt.u32.totalorder %s739_s28, %s912_s7 }
 0x2e7   :  { %p745_p7 = pnand %p743_p6, %p740_p5 }
 0x2e9   :  { %748 = shalt.err (!%p745_p7)
}
 0x2ea   :  { %553 = dma.vmem_to_hbm [thread:$0]  %s551_s6, 128, %s912_s7, [#allocation3]  }
 0x2eb   :  { %749 = dma.done.wait [#allocation3], 128  }
 0x2ec   :  { %750 = vsyncadd [#allocation3], 4294967168 }
 0x2ed   :  { %557 = vsyncpa [#allocation3], 1 }

</bundles_post_ra>
